<compile_context>
chip_gen: v5e
topology: v5e:2x2
jax: 0.10.0
libtpu: 0.0.40
codegen_flags: <defaults>
</compile_context>

<pallas_src>
import jax
import jax.numpy as jnp
from jax.experimental import pallas as pl
from jax.experimental.pallas import tpu as pltpu


def _round_up(x, m):
    return (x + m - 1) // m * m


# ----------------------------------------------------------------------------
# Pallas kernel: fused conv1 (3x conv_bn [1,2]/[1,2]) + conv2 (conv_bn [1,1])
# ----------------------------------------------------------------------------
def _sift_conv_kernel(x_ref, w1_ref, w2_ref, w3_ref, w4_ref, b_ref, o_ref):
    """Channels-first fused conv stack.

    x_ref : (1, 4, 2*Cin_p, TN) bf16 -- pair w holds channels of neighbors
                                        2w and 2w+1 stacked along K.
    w*_ref: (Cout, K) bf16 folded conv+BN weights (two taps fused along K).
    b_ref : (Cout, 4) f32 folded biases, one column per conv layer.
    o_ref : (1, Cout, TN) f32 -- lane-dense (N on lanes), matches (B, C, N).
    """
    w1 = w1_ref[...]
    w2 = w2_ref[...]
    w3 = w3_ref[...]
    w4 = w4_ref[...]
    bias = b_ref[...]
    b1, b2, b3, b4 = (bias[:, i:i + 1] for i in range(4))

    def layer(w, x, b):
        y = jnp.dot(w, x, preferred_element_type=jnp.float32) + b
        return jnp.maximum(y, 0.0)

    # Depth-first over the binary reduction tree: only two (Cout, TN)
    # intermediates live at a time instead of four h1 slabs.
    def h2_of(pair):
        h1a = layer(w1, x_ref[0, 2 * pair], b1)
        h1b = layer(w1, x_ref[0, 2 * pair + 1], b1)
        h1 = jnp.concatenate([h1a, h1b], axis=0).astype(jnp.bfloat16)
        return layer(w2, h1, b2)                      # fused K = 2*Cout

    h2 = jnp.concatenate([h2_of(0), h2_of(1)], axis=0).astype(jnp.bfloat16)
    h3 = layer(w3, h2, b3).astype(jnp.bfloat16)       # fused K = 2*Cout
    h4 = layer(w4, h3, b4)                            # 1x1 conv
    o_ref[0] = h4.astype(o_ref.dtype)


def sift_conv(grouped, w1, w2, w3, w4, bias):
    """grouped: (B, 4, 2*Cin_p, Np) bf16 -> (B, Cout, Np) f32."""
    B, npair, k1, Np = grouped.shape
    assert npair == 4 and Np % 128 == 0
    c_out = w1.shape[0]

    # Largest lane tile that divides Np (Np is a multiple of 128).  Sized to
    # stay well inside the 64 MiB/TC VMEM of v7x with double buffering.
    tn = next(t for t in (1024, 512, 256, 128) if Np % t == 0)

    in_specs = [
        pl.BlockSpec((1, 4, k1, tn), lambda b, n: (b, 0, 0, n)),
        pl.BlockSpec(w1.shape, lambda b, n: (0, 0)),
        pl.BlockSpec(w2.shape, lambda b, n: (0, 0)),
        pl.BlockSpec(w3.shape, lambda b, n: (0, 0)),
        pl.BlockSpec(w4.shape, lambda b, n: (0, 0)),
        pl.BlockSpec(bias.shape, lambda b, n: (0, 0)),
    ]
    out_specs = pl.BlockSpec((1, c_out, tn), lambda b, n: (b, 0, n))

    return pl.pallas_call(
        _sift_conv_kernel,
        out_shape=jax.ShapeDtypeStruct((B, c_out, Np), jnp.float32),
        grid=(B, Np // tn),
        in_specs=in_specs,
        out_specs=out_specs,
        compiler_params=pltpu.CompilerParams(
            dimension_semantics=("parallel", "parallel")),
    )(grouped, w1, w2, w3, w4, bias)


# ----------------------------------------------------------------------------
# JAX glue: pointsift_select (select_cube) + group_points
# ----------------------------------------------------------------------------
def cube_select(xyz, radius):
    """Port of PointSIFT's select_cube CUDA op: for each point, the nearest
    neighbor (squared Euclidean distance <= radius^2, matching the CUDA
    kernel's `judge_dist = radius * radius`) in each of the 8 sign-octants of
    (dx, dy, dz); falls back to the point itself if an octant is empty.  Ties
    resolve to the lowest index, same as the CUDA scan order."""
    B, N, _ = xyz.shape
    d = xyz[:, None, :, :] - xyz[:, :, None, :]       # d[b,i,j] = xyz[b,j]-xyz[b,i]
    dist = jnp.sum(d * d, axis=-1)                    # (B, N, N)
    not_self = ~jnp.eye(N, dtype=bool)[None]
    valid = (dist <= radius * radius) & not_self
    octant = ((d[..., 0] > 0).astype(jnp.int32) * 4
              + (d[..., 1] > 0).astype(jnp.int32) * 2
              + (d[..., 2] > 0).astype(jnp.int32))    # (B, N, N) in [0, 8)
    self_idx = jnp.broadcast_to(jnp.arange(N, dtype=jnp.int32)[None, :], (B, N))
    big = jnp.asarray(1e10, jnp.float32)
    cols = []
    # TODO(synk): O(8*B*N^2) glue; at large N this should become a Pallas
    # kernel tiled over query rows with a single running-min pass per octant.
    for k in range(8):
        m = valid & (octant == k)
        dk = jnp.where(m, dist, big)
        j = jnp.argmin(dk, axis=-1).astype(jnp.int32)
        found = jnp.any(m, axis=-1)
        cols.append(jnp.where(found, j, self_idx))
    return jnp.stack(cols, axis=-1)                   # (B, N, 8) int32


def build_grouped_cf(xyz, points, idx, use_xyz=True):
    """Gather grouped features directly into channels-first layout.

    Returns (B, 8, C_in, N) f32 -- N stays innermost (lane-dense), so no big
    post-gather transpose is needed before the kernel."""
    def gather_cf(feat):
        ft = jnp.transpose(feat, (0, 2, 1))           # (B, C, N), small transpose
        def per_batch(f, i):                          # f (C, N), i (N, 8)
            return jnp.stack(
                [jnp.take(f, i[:, k], axis=1) for k in range(8)], axis=0)
        return jax.vmap(per_batch)(ft, idx)           # (B, 8, C, N)

    xyz_cf = jnp.transpose(xyz, (0, 2, 1))            # (B, 3, N)
    g_xyz = gather_cf(xyz) - xyz_cf[:, None]          # (B, 8, 3, N)
    if points is not None:
        g_pts = gather_cf(points)
        if use_xyz:
            return jnp.concatenate([g_xyz, g_pts], axis=2)
        return g_pts
    return g_xyz


# ----------------------------------------------------------------------------
# Parameter construction (deterministic), BN folded in eval mode, taps fused
# ----------------------------------------------------------------------------
def init_params(key, c_in, c_out, eps=1e-5):
    # TODO(synk): BatchNorm is reproduced in eval mode (running stats folded
    # into the conv weights); training-mode batch statistics are not reproduced.
    def conv_bn_folded(k, inp, oup, kw):
        ks = jax.random.split(k, 6)
        w = jax.random.normal(ks[0], (oup, inp, 1, kw), jnp.float32) * 0.1
        b = jax.random.normal(ks[1], (oup,), jnp.float32) * 0.1
        gamma = jax.random.uniform(ks[2], (oup,), jnp.float32, 0.5, 1.5)
        beta = jax.random.normal(ks[3], (oup,), jnp.float32) * 0.1
        mean = jax.random.normal(ks[4], (oup,), jnp.float32) * 0.1
        var = jax.random.uniform(ks[5], (oup,), jnp.float32, 0.5, 1.5)
        s = gamma / jnp.sqrt(var + eps)
        return w * s[:, None, None, None], (b - mean) * s + beta

    c_in_pad = _round_up(c_in, 8)
    k1, k2, k3, k4 = jax.random.split(key, 4)
    w1, b1 = conv_bn_folded(k1, c_in, c_out, 2)
    w2, b2 = conv_bn_folded(k2, c_out, c_out, 2)
    w3, b3 = conv_bn_folded(k3, c_out, c_out, 2)
    w4, b4 = conv_bn_folded(k4, c_out, c_out, 1)

    def fuse_taps(w, pad_to):
        # (oup, inp, 1, 2) -> (oup, 2*pad_to): [tap0 | 0-pad | tap1 | 0-pad]
        oup, inp = w.shape[0], w.shape[1]
        z = jnp.zeros((oup, pad_to - inp), jnp.float32)
        return jnp.concatenate([w[:, :, 0, 0], z, w[:, :, 0, 1], z], axis=1)

    w1p = fuse_taps(w1, c_in_pad).astype(jnp.bfloat16)   # (Cout, 2*Cin_p)
    w2p = fuse_taps(w2, c_out).astype(jnp.bfloat16)      # (Cout, 2*Cout)
    w3p = fuse_taps(w3, c_out).astype(jnp.bfloat16)      # (Cout, 2*Cout)
    w4p = w4[:, :, 0, 0].astype(jnp.bfloat16)            # (Cout, Cout)
    bias = jnp.stack([b1, b2, b3, b4], axis=1)           # (Cout, 4) f32
    return w1p, w2p, w3p, w4p, bias


# ----------------------------------------------------------------------------
# Full PointSIFT_module forward
# ----------------------------------------------------------------------------
def pointsift_module_forward(xyz, points, radius, params, use_xyz=True):
    """Returns (xyz, new_points) with new_points of shape (B, C_out, N)."""
    w1, w2, w3, w4, bias = params
    B, N, _ = xyz.shape
    idx = cube_select(xyz, radius)
    g = build_grouped_cf(xyz, points, idx, use_xyz)      # (B, 8, Cin, N) f32
    c_in = g.shape[2]
    c_in_pad = _round_up(c_in, 8)
    n_pad = _round_up(N, 128)
    g = jnp.pad(g, ((0, 0), (0, 0), (0, c_in_pad - c_in), (0, n_pad - N)))
    # Stack neighbor pairs (2w, 2w+1) along the channel axis -> (B,4,2*Cin_p,Np)
    g = g.reshape(B, 4, 2 * c_in_pad, n_pad).astype(jnp.bfloat16)
    out = sift_conv(g, w1, w2, w3, w4, bias)             # (B, Cout, Np)
    return xyz, out[:, :, :N]


# Pure-JAX reference of the conv stack (same bf16 rounding), for validation.
def _conv_reference(g_cf, w1, w2, w3, w4, bias):
    """g_cf: (B, 8, Cin_p, Np) channels-first grouped features (f32, padded)."""
    cin_p = g_cf.shape[2]
    c_out = w1.shape[0]
    f32 = lambda a: a.astype(jnp.float32)
    rebf = lambda a: f32(a.astype(jnp.bfloat16))
    w1a, w1b = f32(w1[:, :cin_p]), f32(w1[:, cin_p:])
    w2a, w2b = f32(w2[:, :c_out]), f32(w2[:, c_out:])
    w3a, w3b = f32(w3[:, :c_out]), f32(w3[:, c_out:])
    w4f = f32(w4)
    b1, b2, b3, b4 = (bias[:, i][None, :, None] for i in range(4))

    x = rebf(g_cf)

    def dense2(wa, wb, a, b, bb):
        y = (jnp.einsum('ok,bkn->bon', wa, a)
             + jnp.einsum('ok,bkn->bon', wb, b) + bb)
        return jnp.maximum(y, 0.0)

    h1 = [rebf(dense2(w1a, w1b, x[:, 2 * w], x[:, 2 * w + 1], b1))
          for w in range(4)]
    h2 = [rebf(dense2(w2a, w2b, h1[2 * w], h1[2 * w + 1], b2)) for w in range(2)]
    h3 = rebf(dense2(w3a, w3b, h2[0], h2[1], b3))
    return jnp.maximum(jnp.einsum('ok,bkn->bon', w4f, h3) + b4, 0.0)


if __name__ == "__main__":
    B, N = 2, 32
    extra_input_channel = 4
    output_channel = 32
    radius = 0.4

    key = jax.random.PRNGKey(0)
    k_xyz, k_pts, k_par = jax.random.split(key, 3)
    xyz = jax.random.uniform(k_xyz, (B, N, 3), jnp.float32)           # unit cube
    points = jax.random.normal(k_pts, (B, N, extra_input_channel), jnp.float32)

    params = init_params(k_par, 3 + extra_input_channel, output_channel)

    xyz_out, new_points = pointsift_module_forward(xyz, points, radius, params)
    new_points = jax.block_until_ready(new_points)

    assert xyz_out.shape == (B, N, 3)
    assert new_points.shape == (B, output_channel, N)
    assert bool(jnp.all(jnp.isfinite(new_points)))

    # Validate the Pallas conv stack against a pure-JAX reference.
    idx = cube_select(xyz, radius)
    g_cf = build_grouped_cf(xyz, points, idx, use_xyz=True)
    c_in = g_cf.shape[2]
    g_pad = jnp.pad(
        g_cf,
        ((0, 0), (0, 0), (0, _round_up(c_in, 8) - c_in),
         (0, _round_up(N, 128) - N)))
    ref = _conv_reference(g_pad, *params)[:, :, :N]
    max_err = float(jnp.max(jnp.abs(ref - new_points)))
    assert max_err < 1e-2, f"max abs diff vs reference: {max_err}"

    print("KERNEL_OK")
</pallas_src>

<mosaic_0001>
module attributes {stable_mosaic.version = 11 : i64} {
  func.func @_sift_conv_kernel(%arg0: i32, %arg1: i32, %arg2: memref<1x4x16x128xbf16, #tpu.memory_space<vmem>>, %arg3: memref<32x16xbf16, #tpu.memory_space<vmem>>, %arg4: memref<32x64xbf16, #tpu.memory_space<vmem>>, %arg5: memref<32x64xbf16, #tpu.memory_space<vmem>>, %arg6: memref<32x32xbf16, #tpu.memory_space<vmem>>, %arg7: memref<32x4xf32, #tpu.memory_space<vmem>>, %arg8: memref<1x32x128xf32, #tpu.memory_space<vmem>>) attributes {dimension_semantics = [#tpu.dimension_semantics<parallel>, #tpu.dimension_semantics<parallel>], iteration_bounds = array<i64: 2, 1>, scalar_prefetch = 0 : i64, scratch_operands = 0 : i64, tpu.core_type = #tpu.core_type<tc>, window_params = [{transform_indices = @transform_0, window_bounds = array<i64: 1, 4, 16, 128>}, {pipeline_mode = #tpu.pipeline_mode<synchronous>, transform_indices = @transform_1, window_bounds = array<i64: 32, 16>}, {pipeline_mode = #tpu.pipeline_mode<synchronous>, transform_indices = @transform_2, window_bounds = array<i64: 32, 64>}, {pipeline_mode = #tpu.pipeline_mode<synchronous>, transform_indices = @transform_3, window_bounds = array<i64: 32, 64>}, {pipeline_mode = #tpu.pipeline_mode<synchronous>, transform_indices = @transform_4, window_bounds = array<i64: 32, 32>}, {pipeline_mode = #tpu.pipeline_mode<synchronous>, transform_indices = @transform_5, window_bounds = array<i64: 32, 4>}, {transform_indices = @transform_6, window_bounds = array<i64: 1, 32, 128>}]} {
    %c0 = arith.constant 0 : index
    %c0_0 = arith.constant 0 : index
    %0 = vector.load %arg3[%c0, %c0_0] : memref<32x16xbf16, #tpu.memory_space<vmem>>, vector<32x16xbf16>
    %c0_1 = arith.constant 0 : index
    %c0_2 = arith.constant 0 : index
    %1 = vector.load %arg4[%c0_1, %c0_2] : memref<32x64xbf16, #tpu.memory_space<vmem>>, vector<32x64xbf16>
    %c0_3 = arith.constant 0 : index
    %c0_4 = arith.constant 0 : index
    %2 = vector.load %arg5[%c0_3, %c0_4] : memref<32x64xbf16, #tpu.memory_space<vmem>>, vector<32x64xbf16>
    %c0_5 = arith.constant 0 : index
    %c0_6 = arith.constant 0 : index
    %3 = vector.load %arg6[%c0_5, %c0_6] : memref<32x32xbf16, #tpu.memory_space<vmem>>, vector<32x32xbf16>
    %c0_7 = arith.constant 0 : index
    %c0_8 = arith.constant 0 : index
    %4 = vector.load %arg7[%c0_7, %c0_8] : memref<32x4xf32, #tpu.memory_space<vmem>>, vector<32x4xf32>
    %5 = vector.extract_strided_slice %4 {offsets = [0, 0], sizes = [32, 1], strides = [1, 1]} : vector<32x4xf32> to vector<32x1xf32>
    %6 = vector.extract_strided_slice %4 {offsets = [0, 1], sizes = [32, 1], strides = [1, 1]} : vector<32x4xf32> to vector<32x1xf32>
    %7 = vector.extract_strided_slice %4 {offsets = [0, 2], sizes = [32, 1], strides = [1, 1]} : vector<32x4xf32> to vector<32x1xf32>
    %8 = vector.extract_strided_slice %4 {offsets = [0, 3], sizes = [32, 1], strides = [1, 1]} : vector<32x4xf32> to vector<32x1xf32>
    %c0_9 = arith.constant 0 : index
    %c0_10 = arith.constant 0 : index
    %c0_11 = arith.constant 0 : index
    %c0_12 = arith.constant 0 : index
    %9 = vector.load %arg2[%c0_9, %c0_10, %c0_11, %c0_12] : memref<1x4x16x128xbf16, #tpu.memory_space<vmem>>, vector<1x1x16x128xbf16>
    %10 = vector.shape_cast %9 : vector<1x1x16x128xbf16> to vector<16x128xbf16>
    %cst = arith.constant dense<0.000000e+00> : vector<32x128xf32>
    %11 = tpu.matmul %0, %10, %cst {dimension_numbers = #tpu.dot_dimension_numbers<[1], [0], [0], [1], [0, 0, 1, 1], [], []>} : vector<32x16xbf16>, vector<16x128xbf16>, vector<32x128xf32> -> vector<32x128xf32>
    %12 = vector.broadcast %5 : vector<32x1xf32> to vector<32x128xf32>
    %13 = arith.addf %11, %12 : vector<32x128xf32>
    %cst_13 = arith.constant 0.000000e+00 : f32
    %14 = vector.broadcast %cst_13 : f32 to vector<32x128xf32>
    %15 = arith.maximumf %13, %14 : vector<32x128xf32>
    %c0_14 = arith.constant 0 : index
    %c1 = arith.constant 1 : index
    %c0_15 = arith.constant 0 : index
    %c0_16 = arith.constant 0 : index
    %16 = vector.load %arg2[%c0_14, %c1, %c0_15, %c0_16] : memref<1x4x16x128xbf16, #tpu.memory_space<vmem>>, vector<1x1x16x128xbf16>
    %17 = vector.shape_cast %16 : vector<1x1x16x128xbf16> to vector<16x128xbf16>
    %cst_17 = arith.constant dense<0.000000e+00> : vector<32x128xf32>
    %18 = tpu.matmul %0, %17, %cst_17 {dimension_numbers = #tpu.dot_dimension_numbers<[1], [0], [0], [1], [0, 0, 1, 1], [], []>} : vector<32x16xbf16>, vector<16x128xbf16>, vector<32x128xf32> -> vector<32x128xf32>
    %19 = vector.broadcast %5 : vector<32x1xf32> to vector<32x128xf32>
    %20 = arith.addf %18, %19 : vector<32x128xf32>
    %cst_18 = arith.constant 0.000000e+00 : f32
    %21 = vector.broadcast %cst_18 : f32 to vector<32x128xf32>
    %22 = arith.maximumf %20, %21 : vector<32x128xf32>
    %23 = tpu.concatenate %15, %22 in 0 : vector<32x128xf32>, vector<32x128xf32> -> vector<64x128xf32>
    %24 = arith.truncf %23 : vector<64x128xf32> to vector<64x128xbf16>
    %cst_19 = arith.constant dense<0.000000e+00> : vector<32x128xf32>
    %25 = tpu.matmul %1, %24, %cst_19 {dimension_numbers = #tpu.dot_dimension_numbers<[1], [0], [0], [1], [0, 0, 1, 1], [], []>} : vector<32x64xbf16>, vector<64x128xbf16>, vector<32x128xf32> -> vector<32x128xf32>
    %26 = vector.broadcast %6 : vector<32x1xf32> to vector<32x128xf32>
    %27 = arith.addf %25, %26 : vector<32x128xf32>
    %cst_20 = arith.constant 0.000000e+00 : f32
    %28 = vector.broadcast %cst_20 : f32 to vector<32x128xf32>
    %29 = arith.maximumf %27, %28 : vector<32x128xf32>
    %c0_21 = arith.constant 0 : index
    %c2 = arith.constant 2 : index
    %c0_22 = arith.constant 0 : index
    %c0_23 = arith.constant 0 : index
    %30 = vector.load %arg2[%c0_21, %c2, %c0_22, %c0_23] : memref<1x4x16x128xbf16, #tpu.memory_space<vmem>>, vector<1x1x16x128xbf16>
    %31 = vector.shape_cast %30 : vector<1x1x16x128xbf16> to vector<16x128xbf16>
    %cst_24 = arith.constant dense<0.000000e+00> : vector<32x128xf32>
    %32 = tpu.matmul %0, %31, %cst_24 {dimension_numbers = #tpu.dot_dimension_numbers<[1], [0], [0], [1], [0, 0, 1, 1], [], []>} : vector<32x16xbf16>, vector<16x128xbf16>, vector<32x128xf32> -> vector<32x128xf32>
    %33 = vector.broadcast %5 : vector<32x1xf32> to vector<32x128xf32>
    %34 = arith.addf %32, %33 : vector<32x128xf32>
    %cst_25 = arith.constant 0.000000e+00 : f32
    %35 = vector.broadcast %cst_25 : f32 to vector<32x128xf32>
    %36 = arith.maximumf %34, %35 : vector<32x128xf32>
    %c0_26 = arith.constant 0 : index
    %c3 = arith.constant 3 : index
    %c0_27 = arith.constant 0 : index
    %c0_28 = arith.constant 0 : index
    %37 = vector.load %arg2[%c0_26, %c3, %c0_27, %c0_28] : memref<1x4x16x128xbf16, #tpu.memory_space<vmem>>, vector<1x1x16x128xbf16>
    %38 = vector.shape_cast %37 : vector<1x1x16x128xbf16> to vector<16x128xbf16>
    %cst_29 = arith.constant dense<0.000000e+00> : vector<32x128xf32>
    %39 = tpu.matmul %0, %38, %cst_29 {dimension_numbers = #tpu.dot_dimension_numbers<[1], [0], [0], [1], [0, 0, 1, 1], [], []>} : vector<32x16xbf16>, vector<16x128xbf16>, vector<32x128xf32> -> vector<32x128xf32>
    %40 = vector.broadcast %5 : vector<32x1xf32> to vector<32x128xf32>
    %41 = arith.addf %39, %40 : vector<32x128xf32>
    %cst_30 = arith.constant 0.000000e+00 : f32
    %42 = vector.broadcast %cst_30 : f32 to vector<32x128xf32>
    %43 = arith.maximumf %41, %42 : vector<32x128xf32>
    %44 = tpu.concatenate %36, %43 in 0 : vector<32x128xf32>, vector<32x128xf32> -> vector<64x128xf32>
    %45 = arith.truncf %44 : vector<64x128xf32> to vector<64x128xbf16>
    %cst_31 = arith.constant dense<0.000000e+00> : vector<32x128xf32>
    %46 = tpu.matmul %1, %45, %cst_31 {dimension_numbers = #tpu.dot_dimension_numbers<[1], [0], [0], [1], [0, 0, 1, 1], [], []>} : vector<32x64xbf16>, vector<64x128xbf16>, vector<32x128xf32> -> vector<32x128xf32>
    %47 = vector.broadcast %6 : vector<32x1xf32> to vector<32x128xf32>
    %48 = arith.addf %46, %47 : vector<32x128xf32>
    %cst_32 = arith.constant 0.000000e+00 : f32
    %49 = vector.broadcast %cst_32 : f32 to vector<32x128xf32>
    %50 = arith.maximumf %48, %49 : vector<32x128xf32>
    %51 = tpu.concatenate %29, %50 in 0 : vector<32x128xf32>, vector<32x128xf32> -> vector<64x128xf32>
    %52 = arith.truncf %51 : vector<64x128xf32> to vector<64x128xbf16>
    %cst_33 = arith.constant dense<0.000000e+00> : vector<32x128xf32>
    %53 = tpu.matmul %2, %52, %cst_33 {dimension_numbers = #tpu.dot_dimension_numbers<[1], [0], [0], [1], [0, 0, 1, 1], [], []>} : vector<32x64xbf16>, vector<64x128xbf16>, vector<32x128xf32> -> vector<32x128xf32>
    %54 = vector.broadcast %7 : vector<32x1xf32> to vector<32x128xf32>
    %55 = arith.addf %53, %54 : vector<32x128xf32>
    %cst_34 = arith.constant 0.000000e+00 : f32
    %56 = vector.broadcast %cst_34 : f32 to vector<32x128xf32>
    %57 = arith.maximumf %55, %56 : vector<32x128xf32>
    %58 = arith.truncf %57 : vector<32x128xf32> to vector<32x128xbf16>
    %cst_35 = arith.constant dense<0.000000e+00> : vector<32x128xf32>
    %59 = tpu.matmul %3, %58, %cst_35 {dimension_numbers = #tpu.dot_dimension_numbers<[1], [0], [0], [1], [0, 0, 1, 1], [], []>} : vector<32x32xbf16>, vector<32x128xbf16>, vector<32x128xf32> -> vector<32x128xf32>
    %60 = vector.broadcast %8 : vector<32x1xf32> to vector<32x128xf32>
    %61 = arith.addf %59, %60 : vector<32x128xf32>
    %cst_36 = arith.constant 0.000000e+00 : f32
    %62 = vector.broadcast %cst_36 : f32 to vector<32x128xf32>
    %63 = arith.maximumf %61, %62 : vector<32x128xf32>
    %c0_37 = arith.constant 0 : index
    %c0_38 = arith.constant 0 : index
    %c0_39 = arith.constant 0 : index
    %64 = vector.load %arg8[%c0_37, %c0_38, %c0_39] : memref<1x32x128xf32, #tpu.memory_space<vmem>>, vector<1x32x128xf32>
    %65 = vector.shape_cast %64 : vector<1x32x128xf32> to vector<32x128xf32>
    %66 = vector.shape_cast %63 : vector<32x128xf32> to vector<1x32x128xf32>
    tpu.vector_store %arg8[%c0_37, %c0_38, %c0_39], %66 {strides = array<i32>} : memref<1x32x128xf32, #tpu.memory_space<vmem>>, vector<1x32x128xf32>,
    return
  }
  func.func @transform_0(%arg0: i32, %arg1: i32) -> (i32, i32, i32, i32) {
    %c0_i32 = arith.constant 0 : i32
    %c0_i32_0 = arith.constant 0 : i32
    %c0_i32_1 = arith.constant 0 : i32
    return %arg0, %c0_i32, %c0_i32_0, %arg1 : i32, i32, i32, i32
  }
  func.func @transform_1(%arg0: i32, %arg1: i32) -> (i32, i32) {
    %c0_i32 = arith.constant 0 : i32
    %c0_i32_0 = arith.constant 0 : i32
    %c0_i32_1 = arith.constant 0 : i32
    return %c0_i32, %c0_i32_0 : i32, i32
  }
  func.func @transform_2(%arg0: i32, %arg1: i32) -> (i32, i32) {
    %c0_i32 = arith.constant 0 : i32
    %c0_i32_0 = arith.constant 0 : i32
    %c0_i32_1 = arith.constant 0 : i32
    return %c0_i32, %c0_i32_0 : i32, i32
  }
  func.func @transform_3(%arg0: i32, %arg1: i32) -> (i32, i32) {
    %c0_i32 = arith.constant 0 : i32
    %c0_i32_0 = arith.constant 0 : i32
    %c0_i32_1 = arith.constant 0 : i32
    return %c0_i32, %c0_i32_0 : i32, i32
  }
  func.func @transform_4(%arg0: i32, %arg1: i32) -> (i32, i32) {
    %c0_i32 = arith.constant 0 : i32
    %c0_i32_0 = arith.constant 0 : i32
    %c0_i32_1 = arith.constant 0 : i32
    return %c0_i32, %c0_i32_0 : i32, i32
  }
  func.func @transform_5(%arg0: i32, %arg1: i32) -> (i32, i32) {
    %c0_i32 = arith.constant 0 : i32
    %c0_i32_0 = arith.constant 0 : i32
    %c0_i32_1 = arith.constant 0 : i32
    return %c0_i32, %c0_i32_0 : i32, i32
  }
  func.func @transform_6(%arg0: i32, %arg1: i32) -> (i32, i32, i32) {
    %c0_i32 = arith.constant 0 : i32
    %c0_i32_0 = arith.constant 0 : i32
    return %arg0, %c0_i32, %arg1 : i32, i32, i32
  }
}

</mosaic_0001>

<bundles_post_ra>
// kernel: tpu_custom_call.1
= control target key start
LH: loop header
LB: loop body
LE: loop exit
PB: predicated region body
PF: predicated region fallthrough
CT: control target
= control target key end

     0   :  { %11 = vsyncpa [#allocation3], 0  ;;  %s1325_s0 = inlined_call_operand.hbm [shape: bf16[2,4,16,128], index: 0, kind: input, shape index: {}]   ;;  %s1326_s1 = inlined_call_operand.vmem [shape: bf16[32,16], index: 1, kind: input, shape index: {}]   ;;  %s1327_s2 = inlined_call_operand.vmem [shape: bf16[32,64], index: 2, kind: input, shape index: {}]   ;;  %s1328_s3 = inlined_call_operand.vmem [shape: bf16[32,64], index: 3, kind: input, shape index: {}]   ;;  %s1329_s4 = inlined_call_operand.vmem [shape: bf16[32,32], index: 4, kind: input, shape index: {}]   ;;  %s1330_s5 = inlined_call_operand.vmem [shape: f32[32,4], index: 5, kind: input, shape index: {}]   ;;  %s1331_s6 = inlined_call_operand.hbm [shape: f32[2,32,128], index: 6, kind: output, shape index: {}]  }
   0x1   :  { %13 = vsyncpa [#allocation3 + $0x1], 0 }
   0x2   :  { %14 = vsyncpa [#allocation4], 0 }
   0x3   :  { %16 = vsyncpa [#allocation4 + $0x1], 0  ;;  %s1121_s21 = smov 0   ;;  %s1123_s22 = smov 0  }
   0x4   :  { %s1125_s23 = smov 0   ;;  %s1127_s24 = smov 0  }
   0x5   :  { %s1129_s25 = smov 0   ;;  %s1131_s26 = smov 0  }
   0x6 LB: > { %s784_s27 = sadd.s32 4294967295, %s1076_s26   ;;  %s785_s28 = sadd.s32 4294967294, %s1076_s26   ;;  %s1076_s26 = sphi %s1131_s26, %s22_s26   ;;  %s1072_s25 = sphi %s1129_s25, %s1343_s25   ;;  %s1068_s24 = sphi %s1127_s24, %s1342_s24   ;;  %s1064_s23 = sphi %s1125_s23, %s1341_s23   ;;  %s1060_s22 = sphi %s1123_s22, %s1340_s22   ;;  %s1056_s21 = sphi %s1121_s21, %s1339_s21  }
   0x7   : > { %s34_s29 = sadd.s32 1, %s1072_s25  ;;  %s43_s30 = sadd.s32 1, %s1064_s23 }
   0x8   : > { %p36_p0 = scmp.ge.s32.totalorder %s34_s29, 2  ;;  %p50_p1 = scmp.ne.s32.totalorder %s1064_s23, %s1060_s22 }
   0x9   : > { %p51_p2 = scmp.eq.s32.totalorder %s1076_s26, 0  ;;  %p56_p3 = scmp.ne.s32.totalorder %s1060_s22, %s1056_s21 }
   0xa   : > { %s1345_s29 = smov (%p36_p0, %s34_s29), 0  ;;  %p57_p5 = scmp.eq.s32.totalorder %s784_s27, 0 }
   0xb   : > { %1333 = sst [smem:[#allocation8_spill]] %s1345_s29  ;;  %p1162_p4 = por %p51_p2, %p50_p1 }
   0xc   : > { %s38_s8 = ssub.s32 %s1072_s25, %s1345_s29  ;;  %p187_p6 = scmp.eq.s32.totalorder %s784_s27, 1 }
   0xd   : > { %p41_p7 = scmp.eq.s32.totalorder %s38_s8, 0  ;;  %p1168_p8 = por %p57_p5, %p56_p3 }
   0xe   : > { %p1172_p9 = por %p187_p6, %p50_p1  ;;  %p193_p10 = scmp.eq.s32.totalorder %s785_s28, 1 }
   0xf   : > { %s1177_s11 = scalar_select %p41_p7, %s1064_s23, %s43_s30  }
  0x10   : > { %p1179_p11 = por %p193_p10, %p56_p3  ;;  %p787_p12 = scmp.ge.s32.totalorder %s1076_s26, 2 }
  0x11   : > { %p895_p13 = scmp.lt.s32.totalorder %s1076_s26, 2  ;;  %s228_s13 = sand.u32 1, %s1064_s23  }
  0x12   : > { %s788_s14 = sshll.u32 %s228_s13, 5  ;;  %s869_s15 = sshll.u32 %s1072_s25, 5 }
  0x13   : > { %s238_s18 = scalar_lea.hbm %s1325_s0, %s869_s15  ;;  %s232_s19 = scalar_lea.vmem [#allocation2], %s788_s14 }
  0x14   : > { %s241_s20 = sshll.u32 %s232_s19, 4  ;;  %s239_s27 = sshll.u32 %s238_s18, 4  ;;  %s242_s20 = int_to_ptr.vmem [resolvable:$true] %s241_s20  ;;  %s240_s27 = int_to_ptr.hbm [resolvable:$true] %s239_s27 }
  0x15   : > { %p888_p0 = pnand %p895_p13, %p1162_p4  ;;  %p791_p1 = scmp.ge.s32.totalorder %s1076_s26, 1 }
  0x16   : > { %s229_s28 = scalar_lea.sflag [#allocation3], %s228_s13  ;;  %s1078_s30 = smov 64  }
  0x17   : > { %s1079_s8 = smov 4   ;;  %p249_p2 = scmp.lt.s32.totalorder %s1076_s26, 3 }
  0x18   : > { %890 = dma.hbm_to_vmem [thread:$0]  (!%p888_p0), %s240_s27, 512, %s242_s20, %s229_s28, %s1078_s30, %s1078_s30, %s1079_s8  }
  0x19   : > { %p250_p3 = pnand %p791_p1, %p249_p2 }
  0x1a   : > { %s1195_s29 = sand.u32 (!%p250_p3), 1, %s1060_s22  }
  0x1b   : > { %253 = sbr.rel (%p250_p3) target bundleno = 745 (0x2e9), region = 44  ;;  %s792_s14 = sshll.u32 (!%p250_p3), %s1195_s29, 5 }
  0x1c   : > { %s256_s15 = scalar_lea.sflag (!%p250_p3), [#allocation3], %s1195_s29  ;;  %s259_s7 = scalar_lea.vmem (!%p250_p3), [#allocation2], %s792_s14 }
  0x20   : > { %1047 = dma.done.wait (%p1168_p8), %s256_s15, 512  }
  0x21   : > { %1049 = vsyncadd (%p1168_p8), %s256_s15, 4294966784  ;;  %v1080_v0 = vmov 0   ;;  %v878_v1 = vld [vmem:[%s259_s7] sm:$0xff]  ;;  %v879_v2 = vld [vmem:[%s259_s7 + $0x8] sm:$0xff]  ;;  %vm348_vm0 = vcmask 130048   ;;  %vm440_vm1 = vcmask 523264  }
  0x22   : > { %954 = vset.pattern.permute.xlu1 %v1080_v0  ;;  %953 = vset.pattern.permute.xlu0 %v1080_v0  ;;  %v870_v3 = vld [vmem:[%s1326_s1] sm:$0xff]  ;;  %v880_v5 = vld [vmem:[%s259_s7 + $0x10] sm:$0xff]  ;;  %v881_v6 = vld [vmem:[%s259_s7 + $0x18] sm:$0xff]  ;;  %v1081_v48 = vmov 1   ;;  %vm648_vm2 = vcmask 261120   ;;  %s288_s15 = scalar_lea.vmem [#allocation5], %s792_s14 }
  0x23   : > { %v1211_v4 = vld [vmem:[%s1330_s5] sm:$0xff]  ;;  %362 = vmatpush.bf16.msra.mxu0 %v878_v1  ;;  %394 = vmatpush.bf16.msra.mxu1 %v879_v2  ;;  %v1216_v7 = vld [vmem:[%s1330_s5 + $0x10] sm:$0xff]  ;;  %v1226_v8 = vld [vmem:[%s1330_s5 + $0x8] sm:$0xff]  ;;  %s882_s7 = sshll.u32 %s1068_s24, 5  ;;  %s696_s18 = sshll.u32 %s288_s15, 4  ;;  %s697_s18 = int_to_ptr.vmem [resolvable:$true] %s696_s18 }
  0x24   : > { %314 = vperm.xlu1 %954, %v1211_v4   ;;  %486 = vmatpush.bf16.msra.mxu3 %v880_v5  ;;  %v1231_v9 = vld [vmem:[%s1330_s5 + $0x18] sm:$0xff]  ;;  %v871_v10 = vld [vmem:[%s1326_s1 + $0x8] sm:$0xff]  ;;  %v872_v47 = vld [vmem:[%s1327_s2] sm:$0xff]  ;;  %s695_s17 = scalar_lea.hbm %s1331_s6, %s882_s7  ;;  %s683_s9 = scalar_lea.sflag [#allocation4], %s1195_s29 }
  0x25   : > { %324 = vperm.xlu0 %953, %v1216_v7   ;;  %955 = vset.pattern.permute.xlu2 %v1081_v48  ;;  %v873_v56 = vld [vmem:[%s1327_s2 + $0x8] sm:$0xff]  ;;  %s698_s14 = sshll.u32 %s695_s17, 4  ;;  %s1014_s28 = scalar_lea.hbm %s1331_s6, 64  ;;  %s699_s14 = int_to_ptr.hbm [resolvable:$true] %s698_s14 }
  0x26   : > { %806 = vmatmul.msk.bf16.vlgmr.msra.gmra.mxu0 %vm348_vm0, %v870_v3  ;;  %814 = vmatmul.msk.bf16.vlgmr.msra.gmra.mxu1 %vm348_vm0, %v870_v3  ;;  %s1008_s19 = sshra.s32 %s699_s14, 4  ;;  %s1009_s19 = int_to_ptr.hbm [resolvable:$true] %s1008_s19 }
  0x27   : > { %518 = vmatpush.bf16.msrb.mxu0 %v881_v6  ;;  %832 = vmatmul.msk.bf16.vlgmr.msra.gmra.mxu3 %vm348_vm0, %v870_v3  ;;  %s1010_s24 = scalar_lea.hbm %s1009_s19, 32  ;;  %p1015_p7 = scmp.lt.s32.totalorder %s1009_s19, %s1331_s6 }
  0x28   : > { %423 = vperm.xlu2 %955, %v1216_v7   ;;  %p1011_p4 = scmp.ne.s32.totalorder %s1009_s19, %s1010_s24  ;;  %p1016_p8 = scmp.lt.s32.totalorder %s1014_s28, %s1010_s24 }
  0x2a   : > { %p1012_p5 = pnand %p1011_p4, %p1172_p9  ;;  %p1017_p10 = por %p1016_p8, %p1015_p7 }
  0x2c   : > { %319 = vperm.xlu1 %954, %v1226_v8   ;;  %p1013_p6 = pneg %p1012_p5 }
  0x2d   : > { %329 = vperm.xlu0 %953, %v1231_v9  }
  0x2e   : > { %p1018_p13 = pnand %p1017_p10, %p1013_p6 }
  0x30   : > { %427 = vperm.xlu2 %955, %v1231_v9  }
  0x34   : > { %957 = vset.pattern.permute.xlu1 %v1081_v48 }
  0x35   : > { %956 = vset.pattern.permute.xlu0 %v1081_v48  ;;  %419 = vperm.xlu1 %957, %v1226_v8   ;;  %v875_v48 = vld [vmem:[%s1328_s3 + $0x8] sm:$0xff] }
  0x36   : > { %807 = vmatmul.msk.bf16.gmra.mxu0 %vm348_vm0, %v871_v10  ;;  %815 = vmatmul.msk.bf16.gmra.mxu1 %vm348_vm0, %v871_v10 }
  0x37   : > { %833 = vmatmul.msk.bf16.gmra.mxu3 %vm348_vm0, %v871_v10  ;;  %415 = vperm.xlu0 %956, %v1211_v4  }
  0x46   : > { %840 = vmatmul.msk.bf16.vlgmr.msrb.gmra.mxu0 %vm348_vm0, %v870_v3 }
  0x56   : > { %841 = vmatmul.msk.bf16.gmra.mxu0 %vm348_vm0, %v871_v10 }
  0x96   : > { %v1243_v15 = vpop.permute.xlu1 %314 }
  0x97   : > { %v325_v16 = vpop.permute.xlu0 %324 }
  0x9e   : > { %v320_v20 = vpop.permute.xlu1 %319 }
  0x9f   : > { %v330_v21 = vpop.permute.xlu0 %329 }
  0xa3   : > { %v364_v11 = vpop.f32.mrf.mxu0  ;;  %v396_v12 = vpop.f32.mrf.mxu1 }
  0xa4   : > { %v397_v22 = vadd.f32 %v396_v12, %v1243_v15  ;;  %v365_v39 = vadd.f32 %v364_v11, %v1243_v15 }
  0xa6   : > { %v406_v28 = vmax.f32 %v397_v22, 0.0  ;;  %v374_v44 = vmax.f32 %v365_v39, 0.0 }
  0xa9   : > { %v416_v22 = vpop.permute.xlu0 %415 }
  0xaa   : > { %v488_v31 = vpop.f32.mrf.mxu3 }
  0xab   : > { %v366_v13 = vpop.f32.mrf.mxu0  ;;  %v398_v14 = vpop.f32.mrf.mxu1  ;;  %v489_v1 = vadd.f32 %v488_v31, %v1243_v15 }
  0xac   : > { %v399_v23 = vadd.f32 %v398_v14, %v320_v20  ;;  %v367_v37 = vadd.f32 %v366_v13, %v320_v20 }
  0xad   : > { %v498_v10 = vmax.f32 %v489_v1, 0.0 }
  0xae   : > { %v407_v29 = vmax.f32 %v399_v23, 0.0  ;;  %v375_v41 = vmax.f32 %v367_v37, 0.0  ;;  %v1082_v37 = vmov 2  }
  0xaf   : > { %960 = vset.pattern.permute.xlu0 %v1082_v37  ;;  %958 = vset.pattern.permute.xlu2 %v1082_v37 }
  0xb0   : > { %v412_v35 = vpack.c.bf16 %v407_v29, %v406_v28  ;;  %v410_v46 = vpack.c.bf16 %v375_v41, %v374_v44  ;;  %570 = vperm.xlu0 %960, %v1226_v8   ;;  %574 = vperm.xlu2 %958, %v1216_v7  }
  0xb1   : > { %959 = vset.pattern.permute.xlu1 %v1082_v37 }
  0xb2   : > { %v490_v43 = vpop.f32.mrf.mxu3  ;;  %578 = vperm.xlu1 %959, %v1231_v9  }
  0xb3   : > { %v369_v17 = vpop.f32.mrf.mxu0  ;;  %v401_v18 = vpop.f32.mrf.mxu1  ;;  %v491_v2 = vadd.f32 %v490_v43, %v320_v20 }
  0xb4   : > { %v402_v19 = vadd.f32 %v401_v18, %v325_v16  ;;  %v370_v34 = vadd.f32 %v369_v17, %v325_v16 }
  0xb5   : > { %v499_v11 = vmax.f32 %v491_v2, 0.0 }
  0xb6   : > { %v408_v26 = vmax.f32 %v402_v19, 0.0  ;;  %v376_v40 = vmax.f32 %v370_v34, 0.0 }
  0xb7   : > { %v534_v13 = vpack.c.bf16 %v499_v11, %v498_v10 }
  0xb8   : > { %566 = vperm.xlu2 %958, %v1211_v4  }
  0xba   : > { %v493_v49 = vpop.f32.mrf.mxu3 }
  0xbb   : > { %v371_v24 = vpop.f32.mrf.mxu0  ;;  %v403_v25 = vpop.f32.mrf.mxu1  ;;  %v494_v60 = vadd.f32 %v493_v49, %v325_v16 }
  0xbc   : > { %v404_v27 = vadd.f32 %v403_v25, %v330_v21  ;;  %v372_v32 = vadd.f32 %v371_v24, %v330_v21 }
  0xbd   : > { %v500_v3 = vmax.f32 %v494_v60, 0.0 }
  0xbe   : > { %v409_v30 = vmax.f32 %v404_v27, 0.0  ;;  %v377_v38 = vmax.f32 %v372_v32, 0.0 }
  0xc0   : > { %v413_v33 = vpack.c.bf16 %v409_v30, %v408_v26  ;;  %v411_v42 = vpack.c.bf16 %v377_v38, %v376_v40 }
  0xc2   : > { %451 = vmatpush.bf16.msra.mxu2 %v413_v33  ;;  %v495_v55 = vpop.f32.mrf.mxu3 }
  0xc3   : > { %v520_v36 = vpop.f32.mrf.mxu0  ;;  %v496_v62 = vadd.f32 %v495_v55, %v330_v21  ;;  %v1083_v55 = vmov 3  }
  0xc4   : > { %v521_v57 = vadd.f32 %v520_v36, %v1243_v15  ;;  %v424_v15 = vpop.permute.xlu2 %423  ;;  %961 = vset.pattern.permute.xlu1 %v1083_v55  ;;  %962 = vset.pattern.permute.xlu2 %v1083_v55 }
  0xc5   : > { %v501_v5 = vmax.f32 %v496_v62, 0.0  ;;  %623 = vperm.xlu1 %961, %v1211_v4   ;;  %627 = vperm.xlu2 %962, %v1226_v8   ;;  %v876_v8 = vld [vmem:[%s1329_s4] sm:$0xff] }
  0xc6   : > { %452 = vmatpush.bf16.msra.mxu2 %v412_v35  ;;  %v530_v0 = vmax.f32 %v521_v57, 0.0  ;;  %963 = vset.pattern.permute.xlu0 %v1083_v55 }
  0xc7   : > { %v535_v12 = vpack.c.bf16 %v501_v5, %v500_v3  ;;  %v877_v3 = vld [vmem:[%s1329_s4 + $0x8] sm:$0xff] }
  0xca   : > { %453 = vmatpush.bf16.msra.mxu2 %v411_v42 }
  0xcb   : > { %v522_v45 = vpop.f32.mrf.mxu0 }
  0xcc   : > { %v523_v53 = vadd.f32 %v522_v45, %v320_v20  ;;  %v428_v24 = vpop.permute.xlu2 %427 }
  0xcd   : > { %631 = vperm.xlu1 %961, %v1216_v7   ;;  %635 = vperm.xlu2 %962, %v1231_v9  }
  0xce   : > { %454 = vmatpush.bf16.msra.mxu2 %v410_v46  ;;  %v531_v61 = vmax.f32 %v523_v53, 0.0 }
  0xd0   : > { %v536_v6 = vpack.c.bf16 %v531_v61, %v530_v0 }
  0xd1   : > { %824 = vmatmul.msk.bf16.vlgmr.msra.gmra.mxu2 %vm440_vm1, %v872_v47 }
  0xd3   : > { %v525_v50 = vpop.f32.mrf.mxu0 }
  0xd4   : > { %v526_v51 = vadd.f32 %v525_v50, %v325_v16 }
  0xd6   : > { %v532_v58 = vmax.f32 %v526_v51, 0.0 }
  0xdb   : > { %v527_v52 = vpop.f32.mrf.mxu0 }
  0xdc   : > { %v528_v54 = vadd.f32 %v527_v52, %v330_v21  ;;  %v420_v21 = vpop.permute.xlu1 %419 }
  0xde   : > { %v533_v59 = vmax.f32 %v528_v54, 0.0 }
  0xe0   : > { %v537_v63 = vpack.c.bf16 %v533_v59, %v532_v58 }
  0xe1   : > { %825 = vmatmul.msk.bf16.gmra.mxu2 %vm440_vm1, %v873_v56 }
  0xe2   : > { %542 = vmatpush.bf16.msrb.mxu1 %v537_v63 }
  0xe6   : > { %543 = vmatpush.bf16.msrb.mxu1 %v536_v6 }
  0xea   : > { %544 = vmatpush.bf16.msrb.mxu1 %v535_v12 }
  0xee   : > { %545 = vmatpush.bf16.msrb.mxu1 %v534_v13 }
  0xf1   : > { %842 = vmatmul.msk.bf16.vlgmr.msrb.gmra.mxu1 %vm440_vm1, %v872_v47  ;;  %v874_v47 = vld [vmem:[%s1328_s3] sm:$0xff] }
 0x101   : > { %843 = vmatmul.msk.bf16.gmra.mxu1 %vm440_vm1, %v873_v56 }
 0x10a   : > { %v575_v51 = vpop.permute.xlu2 %574 }
 0x112   : > { %v567_v57 = vpop.permute.xlu2 %566 }
 0x11f   : > { %v628_v9 = vpop.permute.xlu2 %627 }
 0x122   : > { %v571_v53 = vpop.permute.xlu0 %570 }
 0x124   : > { %v579_v54 = vpop.permute.xlu1 %578 }
 0x137   : > { %v624_v5 = vpop.permute.xlu1 %623 }
 0x154   : > { %v456_v14 = vpop.f32.mrf.mxu2 }
 0x155   : > { %v457_v38 = vadd.f32 %v456_v14, %v416_v22  ;;  %v632_v14 = vpop.permute.xlu1 %631 }
 0x157   : > { %v466_v43 = vmax.f32 %v457_v38, 0.0 }
 0x15c   : > { %v458_v17 = vpop.f32.mrf.mxu2 }
 0x15d   : > { %v459_v39 = vadd.f32 %v458_v17, %v420_v21 }
 0x15f   : > { %v467_v44 = vmax.f32 %v459_v39, 0.0 }
 0x161   : > { %v561_v46 = vpack.c.bf16 %v467_v44, %v466_v43 }
 0x164   : > { %v461_v19 = vpop.f32.mrf.mxu2 }
 0x165   : > { %v462_v32 = vadd.f32 %v461_v19, %v424_v15 }
 0x167   : > { %v468_v40 = vmax.f32 %v462_v32, 0.0 }
 0x16c   : > { %v463_v28 = vpop.f32.mrf.mxu2 }
 0x16d   : > { %v464_v34 = vadd.f32 %v463_v28, %v428_v24 }
 0x16e   : > { %v547_v16 = vpop.f32.mrf.mxu1 }
 0x16f   : > { %v548_v29 = vadd.f32 %v547_v16, %v416_v22  ;;  %v469_v41 = vmax.f32 %v464_v34, 0.0 }
 0x171   : > { %v557_v36 = vmax.f32 %v548_v29, 0.0  ;;  %v562_v45 = vpack.c.bf16 %v469_v41, %v468_v40 }
 0x176   : > { %v549_v18 = vpop.f32.mrf.mxu1 }
 0x177   : > { %v550_v26 = vadd.f32 %v549_v18, %v420_v21 }
 0x179   : > { %v558_v33 = vmax.f32 %v550_v26, 0.0 }
 0x17b   : > { %v563_v42 = vpack.c.bf16 %v558_v33, %v557_v36 }
 0x17e   : > { %v552_v20 = vpop.f32.mrf.mxu1 }
 0x17f   : > { %v553_v23 = vadd.f32 %v552_v20, %v424_v15  ;;  %v636_v15 = vpop.permute.xlu2 %635 }
 0x181   : > { %v559_v30 = vmax.f32 %v553_v23, 0.0 }
 0x186   : > { %v554_v25 = vpop.f32.mrf.mxu1 }
 0x187   : > { %v555_v27 = vadd.f32 %v554_v25, %v428_v24 }
 0x189   : > { %v560_v31 = vmax.f32 %v555_v27, 0.0 }
 0x18b   : > { %v564_v35 = vpack.c.bf16 %v560_v31, %v559_v30 }
 0x18d   : > { %601 = vmatpush.bf16.msrb.mxu3 %v564_v35 }
 0x191   : > { %602 = vmatpush.bf16.msrb.mxu3 %v563_v42 }
 0x195   : > { %603 = vmatpush.bf16.msrb.mxu3 %v562_v45 }
 0x199   : > { %604 = vmatpush.bf16.msrb.mxu3 %v561_v46 }
 0x19c   : > { %852 = vmatmul.msk.bf16.vlgmr.msrb.gmra.mxu3 %vm440_vm1, %v874_v47 }
 0x1ac   : > { %853 = vmatmul.msk.bf16.gmra.mxu3 %vm440_vm1, %v875_v48 }
 0x21f   : > { %v606_v49 = vpop.f32.mrf.mxu3 }
 0x220   : > { %v607_v61 = vadd.f32 %v606_v49, %v567_v57 }
 0x222   : > { %v616_v2 = vmax.f32 %v607_v61, 0.0 }
 0x227   : > { %v608_v50 = vpop.f32.mrf.mxu3 }
 0x228   : > { %v609_v59 = vadd.f32 %v608_v50, %v571_v53 }
 0x22a   : > { %v617_v0 = vmax.f32 %v609_v59, 0.0 }
 0x22c   : > { %v620_v4 = vpack.c.bf16 %v617_v0, %v616_v2 }
 0x22f   : > { %v611_v52 = vpop.f32.mrf.mxu3 }
 0x230   : > { %v612_v56 = vadd.f32 %v611_v52, %v575_v51 }
 0x232   : > { %v618_v62 = vmax.f32 %v612_v56, 0.0 }
 0x237   : > { %v613_v58 = vpop.f32.mrf.mxu3 }
 0x238   : > { %v614_v60 = vadd.f32 %v613_v58, %v579_v54 }
 0x23a   : > { %v619_v63 = vmax.f32 %v614_v60, 0.0 }
 0x23c   : > { %v621_v1 = vpack.c.bf16 %v619_v63, %v618_v62 }
 0x23e   : > { %661 = vmatpush.bf16.msrb.mxu2 %v621_v1 }
 0x242   : > { %662 = vmatpush.bf16.msrb.mxu2 %v620_v4 }
 0x245   : > { %862 = vmatmul.msk.bf16.vlgmr.msrb.gmra.mxu2 %vm648_vm2, %v876_v8 }
 0x255   : > { %863 = vmatmul.msk.bf16.gmra.mxu2 %vm648_vm2, %v877_v3 }
 0x2c8   : > { %v664_v6 = vpop.f32.mrf.mxu2 }
 0x2c9   : > { %v665_v10 = vadd.f32 %v664_v6, %v624_v5 }
 0x2cb   : > { %v674_v7 = vmax.f32 %v665_v10, 0.0 }
 0x2cd   : > { %678 = vst [vmem:[%s288_s15] sm:$0xff] %v674_v7 }
 0x2d0   : > { %v666_v11 = vpop.f32.mrf.mxu2 }
 0x2d1   : > { %v667_v12 = vadd.f32 %v666_v11, %v628_v9 }
 0x2d3   : > { %v675_v13 = vmax.f32 %v667_v12, 0.0 }
 0x2d5   : > { %679 = vst [vmem:[%s288_s15 + $0x8] sm:$0xff] %v675_v13 }
 0x2d8   : > { %v669_v16 = vpop.f32.mrf.mxu2 }
 0x2d9   : > { %v670_v17 = vadd.f32 %v669_v16, %v632_v14 }
 0x2db   : > { %v676_v18 = vmax.f32 %v670_v17, 0.0 }
 0x2dd   : > { %680 = vst [vmem:[%s288_s15 + $0x10] sm:$0xff] %v676_v18 }
 0x2e0   : > { %v671_v19 = vpop.f32.mrf.mxu2 }
 0x2e1   : > { %v672_v20 = vadd.f32 %v671_v19, %v636_v15 }
 0x2e3   : > { %v677_v21 = vmax.f32 %v672_v20, 0.0 }
 0x2e5   : > { %681 = vst [vmem:[%s288_s15 + $0x18] sm:$0xff] %v677_v21 }
 0x2e6   : > { %1021 = shalt.err (!%p1018_p13)
}
 0x2e7   : > { %s1084_s29 = smov 128   ;;  %s1085_s15 = smov 8  }
 0x2e8   : > { %885 = dma.vmem_to_hbm [thread:$0]  (%p1172_p9), %s697_s18, 512, %s699_s14, %s683_s9, %s1084_s29, %s1084_s29, %s1085_s15  }
 0x2e9 PF: > { %s713_s7 = sand.u32 1, %s1056_s21   ;;  %p892_p0 = pnand %p787_p12, %p1179_p11 }
 0x2ea   : > { %s714_s13 = scalar_lea.sflag [#allocation4], %s713_s7 }
 0x2eb   : > { %p893_p1 = pneg %p892_p0 }
 0x2ed   : > { %1051 = dma.done.wait (%p893_p1), %s714_s13, 512  }
 0x2ee   : > { %1053 = vsyncadd (%p893_p1), %s714_s13, 4294966784  ;;  %s22_s26 = sadd.s32 1, %s1076_s26   ;;  %s1338_s10 = sld [smem:[#allocation8_spill]] }
 0x2ef   : > { %p19_p2 = scmp.ge.s32.totalorder %s22_s26, 4   ;;  %s1339_s21 = smov %s1060_s22 }
 0x2f0   : > { %s1340_s22 = smov %s1064_s23  ;;  %s1341_s23 = smov %s1177_s11 }
 0x2f1   : > { %s1342_s24 = smov %s1072_s25  ;;  %21 = sbr.rel (!%p19_p2) target bundleno = 6 (0x6), region = 92 }
 0x2f4   : > { %s1343_s25 = smov %s1338_s10 }
 0x2f6   :  { %720 = vsyncpa [#allocation3], 1 }
 0x2f7   :  { %722 = vsyncpa [#allocation3 + $0x1], 1 }
 0x2f8   :  { %723 = vsyncpa [#allocation4], 1 }
 0x2f9   :  { %725 = vsyncpa [#allocation4 + $0x1], 1 }

</bundles_post_ra>
